<compile_context>
chip_gen: v6e
topology: v6e:2x2x1
jax: 0.10.0
libtpu: 0.0.40
codegen_flags: <defaults>
</compile_context>

<pallas_src>
import math

import jax
import jax.numpy as jnp
from jax.experimental import pallas as pl
from jax.experimental.pallas import tpu as pltpu


def _copy_kernel(x_ref, o_ref):
    # x_ref / o_ref: (TR, TL) lane-dense VMEM tiles. Whole-tile copy -> unmasked
    # full-width vector loads/stores; the flatten already happened (for free) in
    # the wrapper reshape.
    o_ref[...] = x_ref[...]


def _sublane_multiple(dtype) -> int:
    """Dtype-native sublane packing: 8 for 32-bit, 16 for 16-bit, 32 for 8-bit."""
    itemsize = jnp.dtype(dtype).itemsize
    if itemsize >= 4:
        return 8
    if itemsize == 2:
        return 16
    return 32


def _choose_lane_dense_layout(B: int, flat: int) -> tuple[int, int]:
    """Pick an order-preserving (R, L) factorization with L a multiple of 128.

    Falls back to (B, flat) when no lane-dense factorization exists (tiny /
    awkward sizes) -- correctness is unaffected, only lane density.
    """
    if flat % 128 == 0:
        return B, flat
    total = B * flat
    for L in (4096, 2048, 1024, 512, 256, 128):
        if total % L == 0:
            return total // L, L
    return B, flat


def flatten_pallas(x, *, use_pallas: bool = True, max_block_bytes: int = 4 << 20):
    """torch.flatten(x, start_dim=1, end_dim=-1) for an N-D tensor (N >= 2)."""
    B = x.shape[0]
    flat = math.prod(x.shape[1:]) if len(x.shape) > 1 else 1

    if not use_pallas:
        # Flatten of a contiguous tensor is metadata-only; this is the right
        # production path (zero HBM traffic). Pallas path kept for the exercise.
        return x.reshape(B, flat)

    itemsize = jnp.dtype(x.dtype).itemsize
    sub = _sublane_multiple(x.dtype)

    # Lane-dense slab (order-preserving); reshape back to (B, flat) at the end.
    R, L = _choose_lane_dense_layout(B, flat)
    x2 = x.reshape(R, L)  # metadata-only

    # --- 2-D tiling against an invariant per-block VMEM budget ---------------
    row_bytes = L * itemsize
    budget_rows = max(0, max_block_bytes // max(1, row_bytes))

    if R <= budget_rows:
        # Whole row extent fits in one block (full-extent dim is always legal).
        tr, tl = R, L
    elif budget_rows >= sub:
        # Tile rows only; keep full lane width, round rows to sublane multiple.
        tr = min(R, (budget_rows // sub) * sub)
        tl = L
    else:
        # A handful of rows already exceeds the budget: tile the lane axis too
        # (multiples of 128 stay lane-dense; never inflates the block).
        tr = min(R, sub)
        max_lanes = (max_block_bytes // max(1, tr * itemsize)) // 128 * 128
        tl = min(L, max(128, max_lanes))

    grid = (pl.cdiv(R, tr), pl.cdiv(L, tl))

    out = pl.pallas_call(
        _copy_kernel,
        out_shape=jax.ShapeDtypeStruct((R, L), x.dtype),
        grid_spec=pltpu.PrefetchScalarGridSpec(
            num_scalar_prefetch=0,
            grid=grid,
            in_specs=[pl.BlockSpec((tr, tl), lambda i, j: (i, j))],
            out_specs=pl.BlockSpec((tr, tl), lambda i, j: (i, j)),
        ),
        compiler_params=pltpu.CompilerParams(
            dimension_semantics=("parallel", "parallel"),
            vmem_limit_bytes=48 << 20,  # > 4x4 MiB double-buffered, < v7x 64 MiB
        ),
        cost_estimate=pl.CostEstimate(
            flops=0,
            transcendentals=0,
            bytes_accessed=2 * R * L * itemsize,
        ),
    )(x2)

    # Metadata-only reshape back to the logical flattened shape.
    return out.reshape(B, flat)


if __name__ == "__main__":
    key = jax.random.PRNGKey(0)
    # Small NCHW input consistent with what a ResNeXt sub-network feeds into
    # Flatten: batch=2, channels=4, spatial=16x16 (flat = 1024, multiple of 128
    # -> fully lane-dense single block).
    x = jax.random.normal(key, (2, 4, 16, 16), dtype=jnp.float32)

    out = flatten_pallas(x, use_pallas=True)
    out = jax.block_until_ready(out)

    # Reference: plain JAX reshape == torch.flatten(x, 1, -1) on contiguous NCHW.
    ref = x.reshape(x.shape[0], -1)

    assert out.shape == ref.shape, (out.shape, ref.shape)
    assert out.dtype == ref.dtype, (out.dtype, ref.dtype)
    assert bool(jnp.array_equal(out, ref)), "Pallas flatten mismatch vs reference"

    print("KERNEL_OK")
</pallas_src>

<mosaic_0001>
module attributes {stable_mosaic.version = 11 : i64} {
  func.func @_copy_kernel(%arg0: i32, %arg1: i32, %arg2: memref<2x1024xf32, #tpu.memory_space<vmem>>, %arg3: memref<2x1024xf32, #tpu.memory_space<vmem>>) attributes {dimension_semantics = [#tpu.dimension_semantics<parallel>, #tpu.dimension_semantics<parallel>], iteration_bounds = array<i64: 1, 1>, scalar_prefetch = 0 : i64, scratch_operands = 0 : i64, tpu.core_type = #tpu.core_type<tc>, window_params = [{transform_indices = @transform_0, window_bounds = array<i64: 2, 1024>}, {transform_indices = @transform_1, window_bounds = array<i64: 2, 1024>}]} {
    %c0 = arith.constant 0 : index
    %c0_0 = arith.constant 0 : index
    %0 = vector.load %arg2[%c0, %c0_0] : memref<2x1024xf32, #tpu.memory_space<vmem>>, vector<2x1024xf32>
    %c0_1 = arith.constant 0 : index
    %c0_2 = arith.constant 0 : index
    %1 = vector.load %arg3[%c0_1, %c0_2] : memref<2x1024xf32, #tpu.memory_space<vmem>>, vector<2x1024xf32>
    tpu.vector_store %arg3[%c0_1, %c0_2], %0 {strides = array<i32>} : memref<2x1024xf32, #tpu.memory_space<vmem>>, vector<2x1024xf32>,
    return
  }
  func.func @transform_0(%arg0: i32, %arg1: i32) -> (i32, i32) {
    %c0_i32 = arith.constant 0 : i32
    return %arg0, %arg1 : i32, i32
  }
  func.func @transform_1(%arg0: i32, %arg1: i32) -> (i32, i32) {
    %c0_i32 = arith.constant 0 : i32
    return %arg0, %arg1 : i32, i32
  }
}

</mosaic_0001>

<bundles_post_ra>
// kernel: tpu_custom_call.1
= control target key start
LH: loop header
LB: loop body
LE: loop exit
PB: predicated region body
PF: predicated region fallthrough
CT: control target
= control target key end

     0   :  { %6 = vsyncpa [#allocation3], 0  ;;  %s104_s0 = inlined_call_operand.hbm [shape: f32[2,1024], index: 0, kind: input, shape index: {}]   ;;  %s105_s1 = inlined_call_operand.hbm [shape: f32[2,1024], index: 1, kind: output, shape index: {}]  }
   0x1   :  { %7 = vsyncpa [#allocation4], 0  ;;  %s86_s6 = smov [#allocation2]  }
   0x2   :  { %s14_s7 = sshll.u32 %s86_s6, 4  ;;  %s15_s7 = int_to_ptr.vmem [resolvable:$true] %s14_s7 }
   0x3   :  { %s50_s8 = scalar_lea.vmem %s15_s7, 256  ;;  %p55_p1 = scmp.lt.s32.totalorder %s15_s7, %s15_s7 }
   0x4   :  { %p51_p0 = scmp.ne.s32.totalorder %s15_s7, %s50_s8  ;;  %p56_p2 = scmp.lt.s32.totalorder %s50_s8, %s50_s8 }
   0x6   :  { %p57_p3 = por %p56_p2, %p55_p1 }
   0x8   :  { %p58_p4 = pnand %p57_p3, %p51_p0 }
   0xa   :  { %61 = shalt.err (!%p58_p4)
}
   0xb   :  { %17 = dma.hbm_to_vmem [thread:$0]  %s104_s0, 256, %s15_s7, [#allocation3]  }
   0xc   :  { %82 = dma.done.wait [#allocation3], 256  }
   0xd   :  { %83 = vsyncadd [#allocation3], 4294967040  ;;  %s87_s11 = smov [#allocation5]   ;;  %v21_v0 = vld [vmem:[#allocation2] sm:$0xff]  ;;  %v22_v1 = vld [vmem:[#allocation2 + $0x8] sm:$0xff] }
   0xe   :  { %s31_s12 = sshll.u32 %s87_s11, 4  ;;  %23 = vst [vmem:[#allocation5] sm:$0xff] %v21_v0  ;;  %24 = vst [vmem:[#allocation5 + $0x8] sm:$0xff] %v22_v1  ;;  %s32_s12 = int_to_ptr.vmem [resolvable:$true] %s31_s12 }
   0xf   :  { %s62_s13 = scalar_lea.vmem %s32_s12, 256  ;;  %p67_p6 = scmp.lt.s32.totalorder %s32_s12, %s32_s12 }
  0x10   :  { %p63_p5 = scmp.ne.s32.totalorder %s32_s12, %s62_s13  ;;  %p68_p7 = scmp.lt.s32.totalorder %s62_s13, %s62_s13 }
  0x12   :  { %p69_p8 = por %p68_p7, %p67_p6 }
  0x14   :  { %p70_p9 = pnand %p69_p8, %p63_p5 }
  0x16   :  { %73 = shalt.err (!%p70_p9)
}
  0x17   :  { %34 = dma.vmem_to_hbm [thread:$0]  %s32_s12, 256, %s105_s1, [#allocation4]  }
  0x18   :  { %84 = dma.done.wait [#allocation4], 256  }
  0x19   :  { %85 = vsyncadd [#allocation4], 4294967040 }
  0x1a   :  { %38 = vsyncpa [#allocation3], 1 }
  0x1b   :  { %39 = vsyncpa [#allocation4], 1 }

</bundles_post_ra>
